<compile_context>
chip_gen: v7x
topology: tpu7x:2x2x1
jax: 0.10.0
libtpu: 0.0.40
codegen_flags: <defaults>
</compile_context>

<pallas_src>
import functools

import jax
import jax.numpy as jnp
from jax.experimental import pallas as pl
from jax.experimental.pallas import tpu as pltpu


_VMEM_LIMIT_BYTES = 48 * 1024 * 1024    # raised scoped-VMEM limit (>=16/32 MiB defaults, <64 MiB v7x physical)
_VMEM_BLOCK_BUDGET = 36 * 1024 * 1024   # ~75% of the limit for pipelined blocks + scratch


def _cdiv(a, b):
    return (a + b - 1) // b


def _round_up(x, m):
    return ((x + m - 1) // m) * m


def _choose_tiles(B, T, D, C_pad, x_itemsize):
    """Pick (TB, TT) from the scoped-VMEM budget.

    Per-step footprint ~ 2*TB*TT*D*isz (x double buffer) + 2*D*C_pad*4 (resident W)
                       + 2*8*C_pad*4 (bias) + 2*TB*C_pad*4 (out) + TB*D*4 (acc scratch).
    """
    budget = _VMEM_BLOCK_BUDGET
    fixed = 2 * D * C_pad * 4 + 2 * 8 * C_pad * 4          # resident weight + bias buffers
    budget = max(budget - fixed, 1 << 20)
    row_fixed = 2 * C_pad * 4 + D * 4                      # out double-buffer + f32 accumulator
    per_t_row = 2 * D * x_itemsize                         # x double-buffer bytes per (row, t)

    # Row-block target: big blocks, but >= 2 row blocks when B > 8 so the
    # "parallel" axis actually feeds both v7x TensorCores.
    if B <= 8:
        tb_target = B
    else:
        tb_target = min(512, _round_up(_cdiv(B, 2), 8))

    # T-chunk: biggest chunk (multiple of 8, or all of T) keeping tb_target rows in budget.
    tt_max = (budget // max(tb_target, 1) - row_fixed) // per_t_row
    if tt_max >= T:
        tt = T
    else:
        tt = max(8, (int(tt_max) // 8) * 8)

    # Final row block under budget with the chosen T chunk.
    per_row = tt * per_t_row + row_fixed
    tb_cap = max(int(budget // per_row), 1)
    if B <= 8:
        tb = B
    else:
        tb = min(tb_target, (tb_cap // 8) * 8)
        tb = max(tb, 8)
    return tb, tt


def _fuse_avg_linear_kernel(x_ref, w_ref, b_ref, o_ref, acc_ref, *, t_total, t_chunk, mask_t):
    # x_ref:   (TB, TT, D) streamed tile of per-frame features
    # w_ref:   (D, Cpad)   resident classifier weight (1/T pre-folded, lane-padded)
    # b_ref:   (1, Cpad)   resident bias row
    # o_ref:   (TB, Cpad)  lane-dense output tile (written once, on the last T step)
    # acc_ref: (TB, D)     f32 temporal-sum accumulator (VMEM scratch)
    t = pl.program_id(1)

    @pl.when(t == 0)
    def _():
        acc_ref[...] = jnp.zeros_like(acc_ref)

    xt = x_ref[...].astype(jnp.float32)                    # bf16-safe accumulation
    if mask_t:  # static: only emitted when T % TT != 0 (ragged last T chunk)
        t_idx = jax.lax.broadcasted_iota(jnp.int32, xt.shape, dimension=1)
        xt = jnp.where(t_idx + t * t_chunk < t_total, xt, 0.0)
    acc_ref[...] += jnp.sum(xt, axis=1)                    # partial temporal sum

    @pl.when(t == pl.num_programs(1) - 1)
    def _():
        # mean pooling: 1/T already folded into w_ref in the wrapper
        out = jnp.dot(acc_ref[...], w_ref[...], preferred_element_type=jnp.float32)
        o_ref[...] = (out + b_ref[...]).astype(o_ref.dtype)


def feature_squeeze_avg_forward(x, weight, bias):
    """FeatureSqueeze forward for fuse_type='avg'.

    x:      (B, T, D)   per-frame features
    weight: (C, D)      nn.Linear weight (PyTorch layout: out_features x in_features)
    bias:   (C,)        nn.Linear bias
    returns (B, C)
    """
    B, T, D = x.shape
    C = weight.shape[0]
    x_itemsize = jnp.dtype(x.dtype).itemsize

    # ---- lane-dense output: pad classifier columns to a multiple of 128,
    #      fold the 1/T mean factor into the tiny resident weight ----
    C_pad = _round_up(max(C, 128), 128)
    w_mat = jnp.zeros((D, C_pad), dtype=jnp.float32).at[:, :C].set(
        weight.T.astype(jnp.float32) / jnp.float32(T))
    b_row = jnp.zeros((1, C_pad), dtype=jnp.float32).at[:, :C].set(
        bias.astype(jnp.float32)[None, :])

    # ---- VMEM-aware tile sizes; no padding of x (ragged last blocks are fine) ----
    TB, TT = _choose_tiles(B, T, D, C_pad, x_itemsize)
    n_rows = _cdiv(B, TB)
    n_t = _cdiv(T, TT)
    mask_t = (TT < T) and (T % TT != 0)

    kernel = functools.partial(
        _fuse_avg_linear_kernel, t_total=T, t_chunk=TT, mask_t=mask_t)

    out = pl.pallas_call(
        kernel,
        out_shape=jax.ShapeDtypeStruct((B, C_pad), x.dtype),
        grid_spec=pltpu.PrefetchScalarGridSpec(
            num_scalar_prefetch=0,
            grid=(n_rows, n_t),
            in_specs=[
                pl.BlockSpec((TB, TT, D), lambda i, t: (i, t, 0)),   # streamed x
                pl.BlockSpec((D, C_pad), lambda i, t: (0, 0)),       # resident weight
                pl.BlockSpec((1, C_pad), lambda i, t: (0, 0)),       # resident bias
            ],
            out_specs=pl.BlockSpec((TB, C_pad), lambda i, t: (i, 0)),
            scratch_shapes=[pltpu.VMEM((TB, D), jnp.float32)],
        ),
        compiler_params=pltpu.CompilerParams(
            dimension_semantics=("parallel", "arbitrary"),
            vmem_limit_bytes=_VMEM_LIMIT_BYTES,
        ),
        cost_estimate=pl.CostEstimate(
            flops=2 * B * D * C_pad + B * T * D,
            transcendentals=0,
            bytes_accessed=x_itemsize * B * T * D
            + 4 * (D * C_pad + C_pad + B * C_pad),
        ),
    )(x, w_mat, b_row)

    return out[:, :C]


if __name__ == "__main__":
    # Small shapes consistent with the module: x is [B, T, D]; in the 'avg' path the
    # classifier acts on D features, so D == hidden_dim (=32 here), num_classes=4.
    B, T, D = 2, 8, 32
    num_classes = 4

    key = jax.random.PRNGKey(0)
    kx, kw, kb = jax.random.split(key, 3)
    x = jax.random.normal(kx, (B, T, D), dtype=jnp.float32)
    weight = jax.random.normal(kw, (num_classes, D), dtype=jnp.float32) * 0.05
    bias = jax.random.normal(kb, (num_classes,), dtype=jnp.float32) * 0.05

    out = feature_squeeze_avg_forward(x, weight, bias)
    jax.block_until_ready(out)

    # sanity check vs plain-JAX reference of the PyTorch forward ('avg' branch)
    ref = x.mean(axis=1) @ weight.T + bias
    assert out.shape == (B, num_classes)
    assert jnp.allclose(out, ref, atol=1e-4, rtol=1e-4)

    print("KERNEL_OK")
</pallas_src>

<mosaic_0001>
module attributes {stable_mosaic.version = 11 : i64} {
  func.func @_fuse_avg_linear_kernel(%arg0: i32, %arg1: i32, %arg2: memref<2x8x32xf32, #tpu.memory_space<vmem>>, %arg3: memref<32x128xf32, #tpu.memory_space<vmem>>, %arg4: memref<1x128xf32, #tpu.memory_space<vmem>>, %arg5: memref<2x128xf32, #tpu.memory_space<vmem>>, %arg6: memref<2x32xf32, #tpu.memory_space<vmem>>) attributes {dimension_semantics = [#tpu.dimension_semantics<parallel>, #tpu.dimension_semantics<arbitrary>], iteration_bounds = array<i64: 1, 1>, scalar_prefetch = 0 : i64, scratch_operands = 1 : i64, tpu.core_type = #tpu.core_type<tc>, window_params = [{transform_indices = @transform_0, window_bounds = array<i64: 2, 8, 32>}, {pipeline_mode = #tpu.pipeline_mode<synchronous>, transform_indices = @transform_1, window_bounds = array<i64: 32, 128>}, {pipeline_mode = #tpu.pipeline_mode<synchronous>, transform_indices = @transform_2, window_bounds = array<i64: 1, 128>}, {transform_indices = @transform_3, window_bounds = array<i64: 2, 128>}]} {
    %c0_i32 = arith.constant 0 : i32
    %0 = arith.cmpi eq, %arg1, %c0_i32 : i32
    %1 = arith.extui %0 : i1 to i32
    %c0_i32_0 = arith.constant 0 : i32
    %2 = arith.cmpi ne, %1, %c0_i32_0 : i32
    scf.if %2 {
      %cst_9 = arith.constant 0.000000e+00 : f32
      %11 = vector.broadcast %cst_9 : f32 to vector<2x32xf32>
      %c0_10 = arith.constant 0 : index
      %c0_11 = arith.constant 0 : index
      %12 = vector.load %arg6[%c0_10, %c0_11] : memref<2x32xf32, #tpu.memory_space<vmem>>, vector<2x32xf32>
      tpu.vector_store %arg6[%c0_10, %c0_11], %11 {strides = array<i32>} : memref<2x32xf32, #tpu.memory_space<vmem>>, vector<2x32xf32>,
    } else {
    }
    %c0 = arith.constant 0 : index
    %c0_1 = arith.constant 0 : index
    %c0_2 = arith.constant 0 : index
    %3 = vector.load %arg2[%c0, %c0_1, %c0_2] : memref<2x8x32xf32, #tpu.memory_space<vmem>>, vector<2x8x32xf32>
    %c0_3 = arith.constant 0 : index
    %c0_4 = arith.constant 0 : index
    %4 = vector.load %arg6[%c0_3, %c0_4] : memref<2x32xf32, #tpu.memory_space<vmem>>, vector<2x32xf32>
    %cst = arith.constant dense<0.000000e+00> : vector<2x32xf32>
    %5 = vector.multi_reduction <add>, %3, %cst [1] : vector<2x8x32xf32> to vector<2x32xf32>
    %6 = arith.addf %4, %5 : vector<2x32xf32>
    %c0_5 = arith.constant 0 : index
    %c0_6 = arith.constant 0 : index
    %7 = vector.load %arg6[%c0_5, %c0_6] : memref<2x32xf32, #tpu.memory_space<vmem>>, vector<2x32xf32>
    tpu.vector_store %arg6[%c0_5, %c0_6], %6 {strides = array<i32>} : memref<2x32xf32, #tpu.memory_space<vmem>>, vector<2x32xf32>,
    %c0_i32_7 = arith.constant 0 : i32
    %8 = arith.cmpi eq, %arg1, %c0_i32_7 : i32
    %9 = arith.extui %8 : i1 to i32
    %c0_i32_8 = arith.constant 0 : i32
    %10 = arith.cmpi ne, %9, %c0_i32_8 : i32
    scf.if %10 {
      %c0_9 = arith.constant 0 : index
      %c0_10 = arith.constant 0 : index
      %11 = vector.load %arg6[%c0_9, %c0_10] : memref<2x32xf32, #tpu.memory_space<vmem>>, vector<2x32xf32>
      %c0_11 = arith.constant 0 : index
      %c0_12 = arith.constant 0 : index
      %12 = vector.load %arg3[%c0_11, %c0_12] : memref<32x128xf32, #tpu.memory_space<vmem>>, vector<32x128xf32>
      %cst_13 = arith.constant dense<0.000000e+00> : vector<2x128xf32>
      %13 = tpu.matmul %11, %12, %cst_13 {dimension_numbers = #tpu.dot_dimension_numbers<[1], [0], [0], [1], [0, 0, 1, 1], [], []>} : vector<2x32xf32>, vector<32x128xf32>, vector<2x128xf32> -> vector<2x128xf32>
      %c0_14 = arith.constant 0 : index
      %c0_15 = arith.constant 0 : index
      %14 = vector.load %arg4[%c0_14, %c0_15] : memref<1x128xf32, #tpu.memory_space<vmem>>, vector<1x128xf32>
      %15 = vector.broadcast %14 : vector<1x128xf32> to vector<2x128xf32>
      %16 = arith.addf %13, %15 : vector<2x128xf32>
      %c0_16 = arith.constant 0 : index
      %c0_17 = arith.constant 0 : index
      %17 = vector.load %arg5[%c0_16, %c0_17] : memref<2x128xf32, #tpu.memory_space<vmem>>, vector<2x128xf32>
      tpu.vector_store %arg5[%c0_16, %c0_17], %16 {strides = array<i32>} : memref<2x128xf32, #tpu.memory_space<vmem>>, vector<2x128xf32>,
    } else {
    }
    return
  }
  func.func @transform_0(%arg0: i32, %arg1: i32) -> (i32, i32, i32) {
    %c0_i32 = arith.constant 0 : i32
    %c0_i32_0 = arith.constant 0 : i32
    return %arg0, %arg1, %c0_i32 : i32, i32, i32
  }
  func.func @transform_1(%arg0: i32, %arg1: i32) -> (i32, i32) {
    %c0_i32 = arith.constant 0 : i32
    %c0_i32_0 = arith.constant 0 : i32
    %c0_i32_1 = arith.constant 0 : i32
    return %c0_i32, %c0_i32_0 : i32, i32
  }
  func.func @transform_2(%arg0: i32, %arg1: i32) -> (i32, i32) {
    %c0_i32 = arith.constant 0 : i32
    %c0_i32_0 = arith.constant 0 : i32
    %c0_i32_1 = arith.constant 0 : i32
    return %c0_i32, %c0_i32_0 : i32, i32
  }
  func.func @transform_3(%arg0: i32, %arg1: i32) -> (i32, i32) {
    %c0_i32 = arith.constant 0 : i32
    %c0_i32_0 = arith.constant 0 : i32
    return %arg0, %c0_i32 : i32, i32
  }
}

</mosaic_0001>

<bundles_post_ra>
// kernel: tpu_custom_call.1
= control target key start
LH: loop header
LB: loop body
LE: loop exit
PB: predicated region body
PF: predicated region fallthrough
CT: control target
= control target key end

     0   :  { %8 = vsyncpa [#allocation4], 0  ;;  %s356_s0 = inlined_call_operand.hbm [shape: f32[2,8,32], index: 0, kind: input, shape index: {}]   ;;  %s357_s1 = inlined_call_operand.hbm [shape: f32[32,128], index: 1, kind: input, shape index: {}]   ;;  %s358_s2 = inlined_call_operand.vmem [shape: f32[1,128], index: 2, kind: input, shape index: {}]   ;;  %s359_s3 = inlined_call_operand.hbm [shape: f32[2,128], index: 3, kind: output, shape index: {}]  }
   0x1   :  { %9 = vsyncpa [#allocation7], 0 }
   0x2   :  { %10 = vsyncpa [#allocation5], 0  ;;  %s284_s12 = smov [#allocation3]   ;;  %s212_s16 = scalar_lea.hbm %s356_s0, 256 }
   0x3   :  { %s16_s13 = sshll.u32 %s284_s12, 4  ;;  %p213_p0 = scmp.ne.s32.totalorder %s356_s0, %s212_s16  ;;  %s17_s13 = int_to_ptr.vmem [resolvable:$true] %s16_s13 }
   0x4   :  { %p216_p1 = scmp.lt.u32.totalorder %s212_s16, %s356_s0 }
   0x6   :  { %p218_p2 = pnand %p216_p1, %p213_p0 }
   0x8   :  { %221 = shalt.err (!%p218_p2)
}
   0x9   :  { %s222_s21 = scalar_lea.vmem %s17_s13, 256  ;;  %p227_p4 = scmp.lt.s32.totalorder %s17_s13, %s17_s13 }
   0xa   :  { %p223_p3 = scmp.ne.s32.totalorder %s17_s13, %s222_s21  ;;  %p228_p5 = scmp.lt.s32.totalorder %s222_s21, %s222_s21 }
   0xc   :  { %p229_p6 = por %p228_p5, %p227_p4 }
   0xe   :  { %p230_p7 = pnand %p229_p6, %p223_p3 }
  0x10   :  { %233 = shalt.err (!%p230_p7)
}
  0x11   :  { %s285_s22 = smov 128   ;;  %s286_s23 = smov 8  }
  0x12   :  { %22 = dma.hbm_to_vmem [thread:$0]  %s356_s0, 256, %s17_s13, [#allocation4], %s285_s22, %s285_s22, %s286_s23  }
  0x13   :  { %s287_s26 = smov [#allocation6]   ;;  %s234_s30 = scalar_lea.hbm %s357_s1, 512 }
  0x14   :  { %s28_s27 = sshll.u32 %s287_s26, 4  ;;  %p235_p8 = scmp.ne.s32.totalorder %s357_s1, %s234_s30  ;;  %s29_s27 = int_to_ptr.vmem [resolvable:$true] %s28_s27 }
  0x15   :  { %p238_p9 = scmp.lt.u32.totalorder %s234_s30, %s357_s1 }
  0x17   :  { %p240_p10 = pnand %p238_p9, %p235_p8 }
  0x19   :  { %243 = shalt.err (!%p240_p10)
}
  0x1a   :  { %s244_s8 = scalar_lea.vmem %s29_s27, 512  ;;  %p249_p12 = scmp.lt.s32.totalorder %s29_s27, %s29_s27 }
  0x1b   :  { %p245_p11 = scmp.ne.s32.totalorder %s29_s27, %s244_s8  ;;  %p250_p13 = scmp.lt.s32.totalorder %s244_s8, %s244_s8 }
  0x1d   :  { %p251_p0 = por %p250_p13, %p249_p12 }
  0x1f   :  { %p252_p1 = pnand %p251_p0, %p245_p11 }
  0x21   :  { %255 = shalt.err (!%p252_p1)
}
  0x22   :  { %34 = dma.hbm_to_vmem [thread:$0]  %s357_s1, 512, %s29_s27, [#allocation7], %s285_s22, %s285_s22, %s286_s23  }
  0x23   :  { %278 = dma.done.wait [#allocation4], 256  }
  0x24   :  { %279 = vsyncadd [#allocation4], 4294967040 }
  0x25   :  { %280 = dma.done.wait [#allocation7], 512  }
  0x26   :  { %281 = vsyncadd [#allocation7], 4294966784  ;;  %vm47_vm0 = vcmask 254976   ;;  %v288_v0 = vmov 0.0|0.0   ;;  %v289_v1 = vmov 0.0   ;;  %vm290_vm1 = vmmov 0  }
  0x27   :  { %198 = vmatprep.subr.bf16.mxu0 %v288_v0  ;;  %48 = vst.msk [vmem:[#allocation2] sm:$0x3] %vm47_vm0, %v289_v1  ;;  %195 = vmatprep.mubr.msk.f32.mxu0 %vm290_vm1, %v289_v1  ;;  %vm52_vm2 = vcmask 261120   ;;  %v79_v2 = vld [vmem:[#allocation6] sm:$0xff]  ;;  %v80_v3 = vld [vmem:[#allocation6 + $0x8] sm:$0xff]  ;;  %v81_v4 = vld [vmem:[#allocation6 + $0x10] sm:$0xff] }
  0x28   :  { %v199_v5 = vpack.c.bf16 %v80_v3, %v79_v2  ;;  %v82_v6 = vld [vmem:[#allocation6 + $0x18] sm:$0xff]  ;;  %v49_v7 = vld [vmem:[#allocation3] sm:$0xff]  ;;  %vm69_vm3 = vcmask 1041409   ;;  %v180_v28 = vld [vmem:[%s358_s2] ss:$0 sm:$0xff]  ;;  %s291_s11 = smov [#allocation8]  }
  0x29   :  { %v50_v8 = vld [vmem:[#allocation3 + $0x8] sm:$0xff]  ;;  %v53_v9 = vsel %vm52_vm2, %v49_v7, 0.0  ;;  %v202_v11 = vpack.c.bf16 %v82_v6, %v81_v4  ;;  %s170_s12 = sshll.u32 %s291_s11, 4  ;;  %s171_s12 = int_to_ptr.vmem [resolvable:$true] %s170_s12 }
  0x2a   :  { %v60_v10 = vsel %vm52_vm2, %v50_v8, 0.0  ;;  %200 = vmatpush3.bf16.msra.mxu0 %v199_v5  ;;  %v54_v12 = vrot.slane %v53_v9, 4  ;;  %s256_s13 = scalar_lea.vmem %s171_s12, 32  ;;  %p261_p3 = scmp.lt.s32.totalorder %s171_s12, %s171_s12 }
  0x2b   :  { %v61_v13 = vrot.slane %v60_v10, 4  ;;  %201 = vmatprep.subr.bf16.mxu0 %v288_v0  ;;  %p257_p2 = scmp.ne.s32.totalorder %s171_s12, %s256_s13  ;;  %p262_p4 = scmp.lt.s32.totalorder %s256_s13, %s256_s13 }
  0x2c   :  { %v55_v14 = vadd.f32 %v54_v12, %v53_v9 }
  0x2d   :  { %v62_v15 = vadd.f32 %v61_v13, %v60_v10  ;;  %p263_p5 = por %p262_p4, %p261_p3 }
  0x2e   :  { %203 = vmatpush3.bf16.msra.mxu0 %v202_v11  ;;  %v56_v16 = vrot.slane %v55_v14, 2  ;;  %v51_v22 = vld [vmem:[#allocation2] sm:$0x3] }
  0x2f   :  { %v63_v17 = vrot.slane %v62_v15, 2  ;;  %p264_p6 = pnand %p263_p5, %p257_p2 }
  0x30   :  { %v57_v18 = vadd.f32 %v56_v16, %v55_v14 }
  0x31   :  { %v64_v19 = vadd.f32 %v63_v17, %v62_v15 }
  0x32   :  { %v58_v20 = vrot.slane %v57_v18, 1 }
  0x33   :  { %v65_v21 = vrot.slane %v64_v19, 1 }
  0x34   :  { %v59_v23 = vadd.f32 %v58_v20, %v57_v18 }
  0x35   :  { %v66_v24 = vadd.f32 %v65_v21, %v64_v19 }
  0x37   :  { %v70_v25 = vsel %vm69_vm3, %v66_v24, %v59_v23 }
  0x38   :  { %v72_v26 = vadd.f32 %v70_v25, %v51_v22 }
  0x3a   :  { %74 = vst.msk [vmem:[#allocation2] sm:$0x3] %vm47_vm0, %v72_v26 }
  0x41   :  { %v78_v27 = vld [vmem:[#allocation2] sm:$0x3] }
  0x42   :  { %196 = vmatmul.mubr.msk.f32.vlgmr.msra.gmra.mrb[0].mxu0 %vm52_vm2, %v78_v27 }
 0x115   :  { %v159_v29 = vpop.f32.mrb[0].mxu0 }
 0x116   :  { %v160_v30 = vadd.f32 %v180_v28, %v159_v29  ;;  %v197_v31 = vpop.f32.mrb[1].mxu0 }
 0x118   :  { %163 = vst [vmem:[#allocation8] sm:$0x3] %v160_v30 }
 0x119   :  { %267 = shalt.err (!%p264_p6)
}
 0x11a   :  { %s268_s16 = scalar_lea.hbm %s359_s3, 32 }
 0x11b   :  { %p269_p7 = scmp.ne.s32.totalorder %s359_s3, %s268_s16  ;;  %p272_p8 = scmp.lt.u32.totalorder %s268_s16, %s359_s3 }
 0x11d   :  { %p274_p9 = pnand %p272_p8, %p269_p7 }
 0x11f   :  { %277 = shalt.err (!%p274_p9)
}
 0x120   :  { %173 = dma.vmem_to_hbm [thread:$0]  %s171_s12, 32, %s359_s3, [#allocation5]  }
 0x121   :  { %282 = dma.done.wait [#allocation5], 32  }
 0x122   :  { %283 = vsyncadd [#allocation5], 4294967264 }
 0x123   :  { %177 = vsyncpa [#allocation4], 1 }
 0x124   :  { %178 = vsyncpa [#allocation7], 1 }
 0x125   :  { %179 = vsyncpa [#allocation5], 1 }

</bundles_post_ra>
